<compile_context>
chip_gen: v5e
topology: v5e:2x2
jax: 0.10.0
libtpu: 0.0.40
codegen_flags: <defaults>
</compile_context>

<pallas_src>
import jax
import jax.numpy as jnp
from jax.experimental import pallas as pl
from jax.experimental.pallas import tpu as pltpu

NEG_SLOPE = 0.01  # nn.LeakyReLU default negative_slope


def _leaky_relu(x):
    return jnp.where(x >= 0, x, NEG_SLOPE * x)


def _st_gcn_kernel(xr_ref, x2_ref, A_ref, Wg_ref, Wt_ref, Wr_ref,
                   gb_ref, ob_ref, o_ref):
    """One sample per grid step.

    xr_ref : (1, T*Cin, V)    bf16  rows ordered (t, ci)  -> A contraction
    x2_ref : (1, Cin, T*V)    bf16  lanes ordered (t, v)  -> residual 1x1
    A_ref  : (K, V, V)        bf16
    Wg_ref : (Cout, K*Cin)    bf16  BN1-folded + reordered gcn 1x1 weight
    Wt_ref : (Kt, Cout, Cout) bf16  BN2-folded temporal conv weight
    Wr_ref : (Cout, Cin)      bf16  BNr-folded residual 1x1 weight
    gb_ref : (Cout, T*V)      f32   gcn bias (conv bias . colsum(A)) + BN1 shift
    ob_ref : (Cout, 1)        f32   folded temporal-conv bias + residual bias
    o_ref  : (1, Cout, T*V)   f32
    """
    K, V, _ = A_ref.shape
    Cout, KCin = Wg_ref.shape
    Cin = KCin // K
    Kt = Wt_ref.shape[0]
    TV = x2_ref.shape[2]
    T = TV // V
    pad = (Kt - 1) // 2

    x_rows = xr_ref[0]                                  # (T*Cin, V)  bf16
    x2d = x2_ref[0]                                     # (Cin, T*V)  bf16

    # --- graph contraction first:  XA[k] = x . A[k]   (bf16 x bf16 MXU) ---
    xa = [jnp.dot(x_rows, A_ref[k], preferred_element_type=jnp.float32)
          for k in range(K)]                            # K x (T*Cin, V) f32

    # --- repack rows-(t,ci) x lanes-(w)  ->  rows-(k,ci) x lanes-(t,w) ---
    # Single relayout between the V-lane domain (A matmul) and the lane-dense
    # channel-matmul domain; static slices + concats only.
    cols = []
    for t in range(T):
        blk = [xa[k][t * Cin:(t + 1) * Cin, :] for k in range(K)]   # (Cin, V)
        cols.append(jnp.concatenate(blk, axis=0))       # (K*Cin, V)
    xa2d = jnp.concatenate(cols, axis=-1)               # (K*Cin, T*V) f32

    # --- 1x1 gcn conv (+ folded BN1) as ONE lane-dense MXU matmul ---
    z = jnp.dot(Wg_ref[...], xa2d.astype(jnp.bfloat16),
                preferred_element_type=jnp.float32)     # (Cout, T*V) f32
    z = z + gb_ref[...]
    h = _leaky_relu(z)                                  # f32 elementwise
    h_bf = h.astype(jnp.bfloat16)

    # --- residual 1x1 (+ folded BNr) seeds the accumulator ---
    acc = jnp.dot(Wr_ref[...], x2d, preferred_element_type=jnp.float32)
    acc = acc + ob_ref[...]                             # (bt + br) folded, f32

    # --- temporal conv (Kt x 1, stride 1, zero 'same' padding along T) ---
    # Value accumulation: no scratch read-modify-write, one store at the end.
    for dt in range(Kt):
        off = (dt - pad) * V                            # static lane offset
        if off == 0:
            hseg = h_bf
        elif off > 0:
            hseg = jnp.concatenate(
                [h_bf[:, off:], jnp.zeros((Cout, off), jnp.bfloat16)], axis=-1)
        else:
            hseg = jnp.concatenate(
                [jnp.zeros((Cout, -off), jnp.bfloat16), h_bf[:, :TV + off]],
                axis=-1)
        acc = acc + jnp.dot(Wt_ref[dt], hseg,
                            preferred_element_type=jnp.float32)

    # --- final LeakyReLU + single lane-dense store ---
    o_ref[0] = _leaky_relu(acc).astype(o_ref.dtype)


def st_gcn_forward(x_nctv, A, eff):
    """x_nctv: (N, Cin, T, V) float32 (PyTorch NCHW).  Returns ((N, Cout, T, V), A)."""
    N, Cin, T, V = x_nctv.shape
    K = A.shape[0]
    KCout, Cin2 = eff['Wg_bf'].shape
    assert Cin2 == Cin and A.shape[1] == V
    Cout = KCout // K
    Kt = eff['Wt_bf'].shape[2]
    assert Kt % 2 == 1                 # module asserts kernel_size[0] % 2 == 1
    TV = T * V

    # ---- kernel-side parameter packing (trace-time glue, all cheap) ----
    Wg_r = (eff['Wg_bf'].reshape(K, Cout, Cin)
            .transpose(1, 0, 2).reshape(Cout, K * Cin))             # bf16
    Wt_kcc = jnp.transpose(eff['Wt_bf'], (2, 0, 1))                 # (Kt,Cout,Cout) bf16
    A_bf = A.astype(jnp.bfloat16)
    colsum = jnp.sum(A_bf.astype(jnp.float32), axis=1)              # (K, V)
    gcn_bias = (jnp.einsum('kc,kw->cw', eff['bg'].reshape(K, Cout), colsum)
                + eff['bn1_shift'][:, None])                        # (Cout, V)
    gcn_bias = jnp.tile(gcn_bias, (1, T))                           # (Cout, T*V) f32
    out_bias = (eff['bt'] + eff['br'])[:, None]                     # (Cout, 1)  f32

    # ---- two cheap HBM views of x (bf16): rows-(t,ci) for the A matmul,
    #      lane-dense (Cin, T*V) for the residual 1x1 ----
    x_bf = x_nctv.astype(jnp.bfloat16)
    x_rows = jnp.transpose(x_bf, (0, 2, 1, 3)).reshape(N, T * Cin, V)
    x_2d = x_bf.reshape(N, Cin, TV)

    full = lambda shape: pl.BlockSpec(shape, lambda n, _r=len(shape): (0,) * _r)

    out2d = pl.pallas_call(
        _st_gcn_kernel,
        out_shape=jax.ShapeDtypeStruct((N, Cout, TV), jnp.float32),
        grid_spec=pltpu.PrefetchScalarGridSpec(
            num_scalar_prefetch=0,
            grid=(N,),
            in_specs=[
                pl.BlockSpec((1, T * Cin, V), lambda n: (n, 0, 0)),   # x rows
                pl.BlockSpec((1, Cin, TV), lambda n: (n, 0, 0)),      # x lane-dense
                full((K, V, V)),                                      # A
                full((Cout, K * Cin)),                                # Wg (folded)
                full((Kt, Cout, Cout)),                               # Wt (folded)
                full((Cout, Cin)),                                    # Wr (folded)
                full((Cout, TV)),                                     # gcn bias
                full((Cout, 1)),                                      # out bias
            ],
            out_specs=pl.BlockSpec((1, Cout, TV), lambda n: (n, 0, 0)),
        ),
        compiler_params=pltpu.CompilerParams(
            dimension_semantics=("parallel",)),
    )(x_rows, x_2d, A_bf, Wg_r, Wt_kcc, eff['Wr_bf'], gcn_bias, out_bias)

    return out2d.reshape(N, Cout, T, V), A


# ------------------------- parameter setup (glue) -------------------------

def _fold_bn(gamma, beta, mean, var, eps=1e-5):
    scale = gamma / jnp.sqrt(var + eps)
    shift = beta - mean * scale
    return scale, shift


def init_raw_params(key, Cin, Cout, K, Kt):
    """PyTorch-equivalent raw parameters of the st_gcn block (eval mode)."""
    ks = jax.random.split(key, 9)

    def nrm(k, shape, s=0.3):
        return s * jax.random.normal(k, shape, jnp.float32)

    def bn(k):
        k1, k2, k3, k4 = jax.random.split(k, 4)
        return dict(
            gamma=1.0 + 0.1 * jax.random.normal(k1, (Cout,), jnp.float32),
            beta=0.1 * jax.random.normal(k2, (Cout,), jnp.float32),
            mean=0.1 * jax.random.normal(k3, (Cout,), jnp.float32),
            var=jax.random.uniform(k4, (Cout,), jnp.float32,
                                   minval=0.5, maxval=1.5),
        )

    return dict(
        Wg=nrm(ks[0], (K * Cout, Cin)),        # Conv2d(in, K*out, 1).weight[..., 0, 0]
        bg=nrm(ks[1], (K * Cout,), 0.1),
        Wt=nrm(ks[2], (Cout, Cout, Kt), 0.2),  # Conv2d(out, out, (Kt, 1)).weight[..., 0]
        bt=nrm(ks[3], (Cout,), 0.1),
        Wr=nrm(ks[4], (Cout, Cin)),            # residual 1x1 conv
        br=nrm(ks[5], (Cout,), 0.1),
        bn1=bn(ks[6]), bn2=bn(ks[7]), bnr=bn(ks[8]),
    )


def fold_params(raw):
    """Fold eval-mode BatchNorms into conv weights and quantise to bf16.

    These bf16 'deployment' weights are shared by the Pallas kernel and the
    pure-JAX reference, so the comparison in __main__ only measures
    kernel-side error (layout / algebra / bf16 intermediate accumulation).
    """
    s1, b1 = _fold_bn(**raw['bn1'])
    s2, b2 = _fold_bn(**raw['bn2'])
    sr, brs = _fold_bn(**raw['bnr'])
    Cout = s1.shape[0]
    K = raw['Wg'].shape[0] // Cout

    Wg_eff = raw['Wg'] * jnp.tile(s1, (K,))[:, None]     # BN1 scale -> gcn conv
    bg_eff = raw['bg'] * jnp.tile(s1, (K,))
    Wt_eff = raw['Wt'] * s2[:, None, None]               # BN2 scale -> temporal conv
    bt_eff = s2 * raw['bt'] + b2
    Wr_eff = raw['Wr'] * sr[:, None]                     # BNr scale -> residual conv
    br_eff = sr * raw['br'] + brs

    return dict(
        Wg_bf=Wg_eff.astype(jnp.bfloat16), bg=bg_eff, bn1_shift=b1,
        Wt_bf=Wt_eff.astype(jnp.bfloat16), bt=bt_eff,
        Wr_bf=Wr_eff.astype(jnp.bfloat16), br=br_eff,
    )


# --------------------------- pure-JAX reference ---------------------------

def reference_forward(x, A, eff):
    """Original st_gcn op order, eval-mode BN pre-folded, same bf16 weights
    as the kernel, full-precision f32 math."""
    N, Cin, T, V = x.shape
    K = A.shape[0]
    Wg = eff['Wg_bf'].astype(jnp.float32)      # (K*Cout, Cin)
    Wt = eff['Wt_bf'].astype(jnp.float32)      # (Cout, Cout, Kt)
    Wr = eff['Wr_bf'].astype(jnp.float32)      # (Cout, Cin)
    Cout = Wr.shape[0]
    Kt = Wt.shape[2]
    hi = jax.lax.Precision.HIGHEST

    xb = x.astype(jnp.bfloat16).astype(jnp.float32)
    Ab = A.astype(jnp.bfloat16).astype(jnp.float32)

    # gcn: 1x1 conv -> graph contraction -> (folded) BN1
    y = jnp.einsum('jc,nctv->njtv', Wg, xb, precision=hi)
    y = y + eff['bg'][None, :, None, None]
    y = y.reshape(N, K, Cout, T, V)
    z = jnp.einsum('nkctv,kvw->nctw', y, Ab, precision=hi)
    z = z + eff['bn1_shift'][None, :, None, None]
    h = jnp.where(z >= 0, z, NEG_SLOPE * z)

    # tcn: temporal conv (+ folded BN2); dropout = identity in eval
    pad = (Kt - 1) // 2
    hp = jnp.pad(h, ((0, 0), (0, 0), (pad, pad), (0, 0)))
    out = jnp.zeros((N, Cout, T, V), jnp.float32) + eff['bt'][None, :, None, None]
    for dt in range(Kt):
        out = out + jnp.einsum('oc,nctv->notv', Wt[:, :, dt],
                               hp[:, :, dt:dt + T, :], precision=hi)

    # residual: 1x1 conv (+ folded BNr)
    r = jnp.einsum('oc,nctv->notv', Wr, xb, precision=hi)
    r = r + eff['br'][None, :, None, None]

    out = out + r
    return jnp.where(out >= 0, out, NEG_SLOPE * out), A


if __name__ == "__main__":
    N, Cin, Cout = 2, 4, 16
    T, V = 8, 16
    kernel_size = (3, 3)          # (temporal Kt, spatial K) as in st_gcn
    Kt, K = kernel_size

    key = jax.random.PRNGKey(0)
    kx, kA, kp = jax.random.split(key, 3)
    x = jax.random.normal(kx, (N, Cin, T, V), jnp.float32)
    A = 0.3 * jax.random.normal(kA, (K, V, V), jnp.float32)
    eff = fold_params(init_raw_params(kp, Cin, Cout, K, Kt))

    out, A_out = st_gcn_forward(x, A, eff)
    out = jax.block_until_ready(out)

    ref, _ = reference_forward(x, A, eff)
    assert out.shape == (N, Cout, T, V)
    diff = jnp.abs(out - ref)
    max_err = float(jnp.max(diff))
    mean_err = float(jnp.mean(diff))
    # Tolerance accounts for bf16 intermediate activations (xa, h) fed to the
    # MXU in the kernel vs the full-f32 reference; structural bugs would give
    # O(1) errors.
    if not (max_err < 8e-2 and mean_err < 1.5e-2):
        raise AssertionError(
            f"mismatch vs reference: max abs err = {max_err}, mean = {mean_err}")
    print("KERNEL_OK")
</pallas_src>

<mosaic_0001>
module attributes {stable_mosaic.version = 11 : i64} {
  func.func @_st_gcn_kernel(%arg0: i32, %arg1: memref<1x32x16xbf16, #tpu.memory_space<vmem>>, %arg2: memref<1x4x128xbf16, #tpu.memory_space<vmem>>, %arg3: memref<3x16x16xbf16, #tpu.memory_space<vmem>>, %arg4: memref<16x12xbf16, #tpu.memory_space<vmem>>, %arg5: memref<3x16x16xbf16, #tpu.memory_space<vmem>>, %arg6: memref<16x4xbf16, #tpu.memory_space<vmem>>, %arg7: memref<16x128xf32, #tpu.memory_space<vmem>>, %arg8: memref<16x1xf32, #tpu.memory_space<vmem>>, %arg9: memref<1x16x128xf32, #tpu.memory_space<vmem>>) attributes {dimension_semantics = [#tpu.dimension_semantics<parallel>], iteration_bounds = array<i64: 2>, scalar_prefetch = 0 : i64, scratch_operands = 0 : i64, tpu.core_type = #tpu.core_type<tc>, window_params = [{transform_indices = @transform_0, window_bounds = array<i64: 1, 32, 16>}, {transform_indices = @transform_1, window_bounds = array<i64: 1, 4, 128>}, {pipeline_mode = #tpu.pipeline_mode<synchronous>, transform_indices = @transform_2, window_bounds = array<i64: 3, 16, 16>}, {pipeline_mode = #tpu.pipeline_mode<synchronous>, transform_indices = @transform_3, window_bounds = array<i64: 16, 12>}, {pipeline_mode = #tpu.pipeline_mode<synchronous>, transform_indices = @transform_4, window_bounds = array<i64: 3, 16, 16>}, {pipeline_mode = #tpu.pipeline_mode<synchronous>, transform_indices = @transform_5, window_bounds = array<i64: 16, 4>}, {pipeline_mode = #tpu.pipeline_mode<synchronous>, transform_indices = @transform_6, window_bounds = array<i64: 16, 128>}, {pipeline_mode = #tpu.pipeline_mode<synchronous>, transform_indices = @transform_7, window_bounds = array<i64: 16, 1>}, {transform_indices = @transform_8, window_bounds = array<i64: 1, 16, 128>}]} {
    %c0 = arith.constant 0 : index
    %c0_0 = arith.constant 0 : index
    %c0_1 = arith.constant 0 : index
    %0 = vector.load %arg1[%c0, %c0_0, %c0_1] : memref<1x32x16xbf16, #tpu.memory_space<vmem>>, vector<1x32x16xbf16>
    %1 = vector.shape_cast %0 : vector<1x32x16xbf16> to vector<32x16xbf16>
    %c0_2 = arith.constant 0 : index
    %c0_3 = arith.constant 0 : index
    %c0_4 = arith.constant 0 : index
    %2 = vector.load %arg2[%c0_2, %c0_3, %c0_4] : memref<1x4x128xbf16, #tpu.memory_space<vmem>>, vector<1x4x128xbf16>
    %3 = vector.shape_cast %2 : vector<1x4x128xbf16> to vector<4x128xbf16>
    %c0_5 = arith.constant 0 : index
    %c0_6 = arith.constant 0 : index
    %c0_7 = arith.constant 0 : index
    %4 = vector.load %arg3[%c0_5, %c0_6, %c0_7] : memref<3x16x16xbf16, #tpu.memory_space<vmem>>, vector<1x16x16xbf16>
    %5 = vector.shape_cast %4 : vector<1x16x16xbf16> to vector<16x16xbf16>
    %cst = arith.constant dense<0.000000e+00> : vector<32x16xf32>
    %6 = tpu.matmul %1, %5, %cst {dimension_numbers = #tpu.dot_dimension_numbers<[1], [0], [0], [1], [0, 0, 1, 1], [], []>} : vector<32x16xbf16>, vector<16x16xbf16>, vector<32x16xf32> -> vector<32x16xf32>
    %c1 = arith.constant 1 : index
    %c0_8 = arith.constant 0 : index
    %c0_9 = arith.constant 0 : index
    %7 = vector.load %arg3[%c1, %c0_8, %c0_9] : memref<3x16x16xbf16, #tpu.memory_space<vmem>>, vector<1x16x16xbf16>
    %8 = vector.shape_cast %7 : vector<1x16x16xbf16> to vector<16x16xbf16>
    %cst_10 = arith.constant dense<0.000000e+00> : vector<32x16xf32>
    %9 = tpu.matmul %1, %8, %cst_10 {dimension_numbers = #tpu.dot_dimension_numbers<[1], [0], [0], [1], [0, 0, 1, 1], [], []>} : vector<32x16xbf16>, vector<16x16xbf16>, vector<32x16xf32> -> vector<32x16xf32>
    %c2 = arith.constant 2 : index
    %c0_11 = arith.constant 0 : index
    %c0_12 = arith.constant 0 : index
    %10 = vector.load %arg3[%c2, %c0_11, %c0_12] : memref<3x16x16xbf16, #tpu.memory_space<vmem>>, vector<1x16x16xbf16>
    %11 = vector.shape_cast %10 : vector<1x16x16xbf16> to vector<16x16xbf16>
    %cst_13 = arith.constant dense<0.000000e+00> : vector<32x16xf32>
    %12 = tpu.matmul %1, %11, %cst_13 {dimension_numbers = #tpu.dot_dimension_numbers<[1], [0], [0], [1], [0, 0, 1, 1], [], []>} : vector<32x16xbf16>, vector<16x16xbf16>, vector<32x16xf32> -> vector<32x16xf32>
    %13 = vector.extract_strided_slice %6 {offsets = [0, 0], sizes = [4, 16], strides = [1, 1]} : vector<32x16xf32> to vector<4x16xf32>
    %14 = vector.extract_strided_slice %9 {offsets = [0, 0], sizes = [4, 16], strides = [1, 1]} : vector<32x16xf32> to vector<4x16xf32>
    %15 = vector.extract_strided_slice %12 {offsets = [0, 0], sizes = [4, 16], strides = [1, 1]} : vector<32x16xf32> to vector<4x16xf32>
    %16 = tpu.concatenate %13, %14, %15 in 0 : vector<4x16xf32>, vector<4x16xf32>, vector<4x16xf32> -> vector<12x16xf32>
    %17 = vector.extract_strided_slice %6 {offsets = [4, 0], sizes = [4, 16], strides = [1, 1]} : vector<32x16xf32> to vector<4x16xf32>
    %18 = vector.extract_strided_slice %9 {offsets = [4, 0], sizes = [4, 16], strides = [1, 1]} : vector<32x16xf32> to vector<4x16xf32>
    %19 = vector.extract_strided_slice %12 {offsets = [4, 0], sizes = [4, 16], strides = [1, 1]} : vector<32x16xf32> to vector<4x16xf32>
    %20 = tpu.concatenate %17, %18, %19 in 0 : vector<4x16xf32>, vector<4x16xf32>, vector<4x16xf32> -> vector<12x16xf32>
    %21 = vector.extract_strided_slice %6 {offsets = [8, 0], sizes = [4, 16], strides = [1, 1]} : vector<32x16xf32> to vector<4x16xf32>
    %22 = vector.extract_strided_slice %9 {offsets = [8, 0], sizes = [4, 16], strides = [1, 1]} : vector<32x16xf32> to vector<4x16xf32>
    %23 = vector.extract_strided_slice %12 {offsets = [8, 0], sizes = [4, 16], strides = [1, 1]} : vector<32x16xf32> to vector<4x16xf32>
    %24 = tpu.concatenate %21, %22, %23 in 0 : vector<4x16xf32>, vector<4x16xf32>, vector<4x16xf32> -> vector<12x16xf32>
    %25 = vector.extract_strided_slice %6 {offsets = [12, 0], sizes = [4, 16], strides = [1, 1]} : vector<32x16xf32> to vector<4x16xf32>
    %26 = vector.extract_strided_slice %9 {offsets = [12, 0], sizes = [4, 16], strides = [1, 1]} : vector<32x16xf32> to vector<4x16xf32>
    %27 = vector.extract_strided_slice %12 {offsets = [12, 0], sizes = [4, 16], strides = [1, 1]} : vector<32x16xf32> to vector<4x16xf32>
    %28 = tpu.concatenate %25, %26, %27 in 0 : vector<4x16xf32>, vector<4x16xf32>, vector<4x16xf32> -> vector<12x16xf32>
    %29 = vector.extract_strided_slice %6 {offsets = [16, 0], sizes = [4, 16], strides = [1, 1]} : vector<32x16xf32> to vector<4x16xf32>
    %30 = vector.extract_strided_slice %9 {offsets = [16, 0], sizes = [4, 16], strides = [1, 1]} : vector<32x16xf32> to vector<4x16xf32>
    %31 = vector.extract_strided_slice %12 {offsets = [16, 0], sizes = [4, 16], strides = [1, 1]} : vector<32x16xf32> to vector<4x16xf32>
    %32 = tpu.concatenate %29, %30, %31 in 0 : vector<4x16xf32>, vector<4x16xf32>, vector<4x16xf32> -> vector<12x16xf32>
    %33 = vector.extract_strided_slice %6 {offsets = [20, 0], sizes = [4, 16], strides = [1, 1]} : vector<32x16xf32> to vector<4x16xf32>
    %34 = vector.extract_strided_slice %9 {offsets = [20, 0], sizes = [4, 16], strides = [1, 1]} : vector<32x16xf32> to vector<4x16xf32>
    %35 = vector.extract_strided_slice %12 {offsets = [20, 0], sizes = [4, 16], strides = [1, 1]} : vector<32x16xf32> to vector<4x16xf32>
    %36 = tpu.concatenate %33, %34, %35 in 0 : vector<4x16xf32>, vector<4x16xf32>, vector<4x16xf32> -> vector<12x16xf32>
    %37 = vector.extract_strided_slice %6 {offsets = [24, 0], sizes = [4, 16], strides = [1, 1]} : vector<32x16xf32> to vector<4x16xf32>
    %38 = vector.extract_strided_slice %9 {offsets = [24, 0], sizes = [4, 16], strides = [1, 1]} : vector<32x16xf32> to vector<4x16xf32>
    %39 = vector.extract_strided_slice %12 {offsets = [24, 0], sizes = [4, 16], strides = [1, 1]} : vector<32x16xf32> to vector<4x16xf32>
    %40 = tpu.concatenate %37, %38, %39 in 0 : vector<4x16xf32>, vector<4x16xf32>, vector<4x16xf32> -> vector<12x16xf32>
    %41 = vector.extract_strided_slice %6 {offsets = [28, 0], sizes = [4, 16], strides = [1, 1]} : vector<32x16xf32> to vector<4x16xf32>
    %42 = vector.extract_strided_slice %9 {offsets = [28, 0], sizes = [4, 16], strides = [1, 1]} : vector<32x16xf32> to vector<4x16xf32>
    %43 = vector.extract_strided_slice %12 {offsets = [28, 0], sizes = [4, 16], strides = [1, 1]} : vector<32x16xf32> to vector<4x16xf32>
    %44 = tpu.concatenate %41, %42, %43 in 0 : vector<4x16xf32>, vector<4x16xf32>, vector<4x16xf32> -> vector<12x16xf32>
    %45 = tpu.concatenate %16, %20, %24, %28, %32, %36, %40, %44 in 1 : vector<12x16xf32>, vector<12x16xf32>, vector<12x16xf32>, vector<12x16xf32>, vector<12x16xf32>, vector<12x16xf32>, vector<12x16xf32>, vector<12x16xf32> -> vector<12x128xf32>
    %c0_14 = arith.constant 0 : index
    %c0_15 = arith.constant 0 : index
    %46 = vector.load %arg4[%c0_14, %c0_15] : memref<16x12xbf16, #tpu.memory_space<vmem>>, vector<16x12xbf16>
    %47 = arith.truncf %45 : vector<12x128xf32> to vector<12x128xbf16>
    %cst_16 = arith.constant dense<0.000000e+00> : vector<16x128xf32>
    %48 = tpu.matmul %46, %47, %cst_16 {dimension_numbers = #tpu.dot_dimension_numbers<[1], [0], [0], [1], [0, 0, 1, 1], [], []>} : vector<16x12xbf16>, vector<12x128xbf16>, vector<16x128xf32> -> vector<16x128xf32>
    %c0_17 = arith.constant 0 : index
    %c0_18 = arith.constant 0 : index
    %49 = vector.load %arg7[%c0_17, %c0_18] : memref<16x128xf32, #tpu.memory_space<vmem>>, vector<16x128xf32>
    %50 = arith.addf %48, %49 : vector<16x128xf32>
    %cst_19 = arith.constant 0.000000e+00 : f32
    %51 = vector.broadcast %cst_19 : f32 to vector<16x128xf32>
    %52 = arith.cmpf oge, %50, %51 : vector<16x128xf32>
    %cst_20 = arith.constant 0.00999999977 : f32
    %53 = vector.broadcast %cst_20 : f32 to vector<16x128xf32>
    %54 = arith.mulf %53, %50 : vector<16x128xf32>
    %55 = arith.select %52, %50, %54 : vector<16x128xi1>, vector<16x128xf32>
    %56 = arith.truncf %55 : vector<16x128xf32> to vector<16x128xbf16>
    %c0_21 = arith.constant 0 : index
    %c0_22 = arith.constant 0 : index
    %57 = vector.load %arg6[%c0_21, %c0_22] : memref<16x4xbf16, #tpu.memory_space<vmem>>, vector<16x4xbf16>
    %cst_23 = arith.constant dense<0.000000e+00> : vector<16x128xf32>
    %58 = tpu.matmul %57, %3, %cst_23 {dimension_numbers = #tpu.dot_dimension_numbers<[1], [0], [0], [1], [0, 0, 1, 1], [], []>} : vector<16x4xbf16>, vector<4x128xbf16>, vector<16x128xf32> -> vector<16x128xf32>
    %c0_24 = arith.constant 0 : index
    %c0_25 = arith.constant 0 : index
    %59 = vector.load %arg8[%c0_24, %c0_25] : memref<16x1xf32, #tpu.memory_space<vmem>>, vector<16x1xf32>
    %60 = vector.broadcast %59 : vector<16x1xf32> to vector<16x128xf32>
    %61 = arith.addf %58, %60 : vector<16x128xf32>
    %cst_26 = arith.constant 0.000000e+00 : bf16
    %62 = vector.broadcast %cst_26 : bf16 to vector<16x16xbf16>
    %63 = vector.extract_strided_slice %56 {offsets = [0, 0], sizes = [16, 112], strides = [1, 1]} : vector<16x128xbf16> to vector<16x112xbf16>
    %64 = tpu.concatenate %62, %63 in 1 : vector<16x16xbf16>, vector<16x112xbf16> -> vector<16x128xbf16>
    %c0_27 = arith.constant 0 : index
    %c0_28 = arith.constant 0 : index
    %c0_29 = arith.constant 0 : index
    %65 = vector.load %arg5[%c0_27, %c0_28, %c0_29] : memref<3x16x16xbf16, #tpu.memory_space<vmem>>, vector<1x16x16xbf16>
    %66 = vector.shape_cast %65 : vector<1x16x16xbf16> to vector<16x16xbf16>
    %cst_30 = arith.constant dense<0.000000e+00> : vector<16x128xf32>
    %67 = tpu.matmul %66, %64, %cst_30 {dimension_numbers = #tpu.dot_dimension_numbers<[1], [0], [0], [1], [0, 0, 1, 1], [], []>} : vector<16x16xbf16>, vector<16x128xbf16>, vector<16x128xf32> -> vector<16x128xf32>
    %68 = arith.addf %61, %67 : vector<16x128xf32>
    %c1_31 = arith.constant 1 : index
    %c0_32 = arith.constant 0 : index
    %c0_33 = arith.constant 0 : index
    %69 = vector.load %arg5[%c1_31, %c0_32, %c0_33] : memref<3x16x16xbf16, #tpu.memory_space<vmem>>, vector<1x16x16xbf16>
    %70 = vector.shape_cast %69 : vector<1x16x16xbf16> to vector<16x16xbf16>
    %cst_34 = arith.constant dense<0.000000e+00> : vector<16x128xf32>
    %71 = tpu.matmul %70, %56, %cst_34 {dimension_numbers = #tpu.dot_dimension_numbers<[1], [0], [0], [1], [0, 0, 1, 1], [], []>} : vector<16x16xbf16>, vector<16x128xbf16>, vector<16x128xf32> -> vector<16x128xf32>
    %72 = arith.addf %68, %71 : vector<16x128xf32>
    %73 = vector.extract_strided_slice %56 {offsets = [0, 16], sizes = [16, 112], strides = [1, 1]} : vector<16x128xbf16> to vector<16x112xbf16>
    %cst_35 = arith.constant 0.000000e+00 : bf16
    %74 = vector.broadcast %cst_35 : bf16 to vector<16x16xbf16>
    %75 = tpu.concatenate %73, %74 in 1 : vector<16x112xbf16>, vector<16x16xbf16> -> vector<16x128xbf16>
    %c2_36 = arith.constant 2 : index
    %c0_37 = arith.constant 0 : index
    %c0_38 = arith.constant 0 : index
    %76 = vector.load %arg5[%c2_36, %c0_37, %c0_38] : memref<3x16x16xbf16, #tpu.memory_space<vmem>>, vector<1x16x16xbf16>
    %77 = vector.shape_cast %76 : vector<1x16x16xbf16> to vector<16x16xbf16>
    %cst_39 = arith.constant dense<0.000000e+00> : vector<16x128xf32>
    %78 = tpu.matmul %77, %75, %cst_39 {dimension_numbers = #tpu.dot_dimension_numbers<[1], [0], [0], [1], [0, 0, 1, 1], [], []>} : vector<16x16xbf16>, vector<16x128xbf16>, vector<16x128xf32> -> vector<16x128xf32>
    %79 = arith.addf %72, %78 : vector<16x128xf32>
    %cst_40 = arith.constant 0.000000e+00 : f32
    %80 = vector.broadcast %cst_40 : f32 to vector<16x128xf32>
    %81 = arith.cmpf oge, %79, %80 : vector<16x128xf32>
    %cst_41 = arith.constant 0.00999999977 : f32
    %82 = vector.broadcast %cst_41 : f32 to vector<16x128xf32>
    %83 = arith.mulf %82, %79 : vector<16x128xf32>
    %84 = arith.select %81, %79, %83 : vector<16x128xi1>, vector<16x128xf32>
    %c0_42 = arith.constant 0 : index
    %c0_43 = arith.constant 0 : index
    %c0_44 = arith.constant 0 : index
    %85 = vector.load %arg9[%c0_42, %c0_43, %c0_44] : memref<1x16x128xf32, #tpu.memory_space<vmem>>, vector<1x16x128xf32>
    %86 = vector.shape_cast %85 : vector<1x16x128xf32> to vector<16x128xf32>
    %87 = vector.shape_cast %84 : vector<16x128xf32> to vector<1x16x128xf32>
    tpu.vector_store %arg9[%c0_42, %c0_43, %c0_44], %87 {strides = array<i32>} : memref<1x16x128xf32, #tpu.memory_space<vmem>>, vector<1x16x128xf32>,
    return
  }
  func.func @transform_0(%arg0: i32) -> (i32, i32, i32) {
    %c0_i32 = arith.constant 0 : i32
    %c0_i32_0 = arith.constant 0 : i32
    %c0_i32_1 = arith.constant 0 : i32
    return %arg0, %c0_i32, %c0_i32_0 : i32, i32, i32
  }
  func.func @transform_1(%arg0: i32) -> (i32, i32, i32) {
    %c0_i32 = arith.constant 0 : i32
    %c0_i32_0 = arith.constant 0 : i32
    %c0_i32_1 = arith.constant 0 : i32
    return %arg0, %c0_i32, %c0_i32_0 : i32, i32, i32
  }
  func.func @transform_2(%arg0: i32) -> (i32, i32, i32) {
    %c0_i32 = arith.constant 0 : i32
    %c0_i32_0 = arith.constant 0 : i32
    %c0_i32_1 = arith.constant 0 : i32
    %c0_i32_2 = arith.constant 0 : i32
    return %c0_i32, %c0_i32_0, %c0_i32_1 : i32, i32, i32
  }
  func.func @transform_3(%arg0: i32) -> (i32, i32) {
    %c0_i32 = arith.constant 0 : i32
    %c0_i32_0 = arith.constant 0 : i32
    %c0_i32_1 = arith.constant 0 : i32
    return %c0_i32, %c0_i32_0 : i32, i32
  }
  func.func @transform_4(%arg0: i32) -> (i32, i32, i32) {
    %c0_i32 = arith.constant 0 : i32
    %c0_i32_0 = arith.constant 0 : i32
    %c0_i32_1 = arith.constant 0 : i32
    %c0_i32_2 = arith.constant 0 : i32
    return %c0_i32, %c0_i32_0, %c0_i32_1 : i32, i32, i32
  }
  func.func @transform_5(%arg0: i32) -> (i32, i32) {
    %c0_i32 = arith.constant 0 : i32
    %c0_i32_0 = arith.constant 0 : i32
    %c0_i32_1 = arith.constant 0 : i32
    return %c0_i32, %c0_i32_0 : i32, i32
  }
  func.func @transform_6(%arg0: i32) -> (i32, i32) {
    %c0_i32 = arith.constant 0 : i32
    %c0_i32_0 = arith.constant 0 : i32
    %c0_i32_1 = arith.constant 0 : i32
    return %c0_i32, %c0_i32_0 : i32, i32
  }
  func.func @transform_7(%arg0: i32) -> (i32, i32) {
    %c0_i32 = arith.constant 0 : i32
    %c0_i32_0 = arith.constant 0 : i32
    %c0_i32_1 = arith.constant 0 : i32
    return %c0_i32, %c0_i32_0 : i32, i32
  }
  func.func @transform_8(%arg0: i32) -> (i32, i32, i32) {
    %c0_i32 = arith.constant 0 : i32
    %c0_i32_0 = arith.constant 0 : i32
    %c0_i32_1 = arith.constant 0 : i32
    return %arg0, %c0_i32, %c0_i32_0 : i32, i32, i32
  }
}

</mosaic_0001>

<bundles_post_ra>
// kernel: tpu_custom_call.1
= control target key start
LH: loop header
LB: loop body
LE: loop exit
PB: predicated region body
PF: predicated region fallthrough
CT: control target
= control target key end

     0   :  { %s1461_s0 = inlined_call_operand.vmem [shape: bf16[2,32,16], index: 0, kind: input, shape index: {}]   ;;  %s1462_s1 = inlined_call_operand.hbm [shape: bf16[2,4,128], index: 1, kind: input, shape index: {}]   ;;  %s1463_s2 = inlined_call_operand.vmem [shape: bf16[3,16,16], index: 2, kind: input, shape index: {}]   ;;  %s1464_s3 = inlined_call_operand.vmem [shape: bf16[16,12], index: 3, kind: input, shape index: {}]   ;;  %s1465_s4 = inlined_call_operand.vmem [shape: bf16[3,16,16], index: 4, kind: input, shape index: {}]   ;;  %s1466_s5 = inlined_call_operand.vmem [shape: bf16[16,4], index: 5, kind: input, shape index: {}]   ;;  %s1467_s6 = inlined_call_operand.hbm [shape: f32[16,128], index: 6, kind: input, shape index: {}]   ;;  %s1468_s7 = inlined_call_operand.vmem [shape: f32[16,1], index: 7, kind: input, shape index: {}]   ;;  %s1469_s8 = inlined_call_operand.hbm [shape: f32[2,16,128], index: 8, kind: output, shape index: {}]  }
   0x1   :  { %1470 = sst [smem:[#allocation12_spill]] %s1467_s6 }
   0x2   :  { %13 = vsyncpa [#allocation3], 0 }
   0x3   :  { %15 = vsyncpa [#allocation3 + $0x1], 0 }
   0x4   :  { %16 = vsyncpa [#allocation6], 0 }
   0x5   :  { %17 = vsyncpa [#allocation4], 0 }
   0x6   :  { %19 = vsyncpa [#allocation4 + $0x1], 0  ;;  %s1259_s27 = smov 0   ;;  %s1261_s28 = smov 0  }
   0x7   :  { %s1263_s29 = smov 0   ;;  %s1265_s30 = smov 0  }
   0x8 LB: > { %s1471_s6 = sld [smem:[#allocation12_spill]]  ;;  %s1283_s12 = sadd.s32 4294967295, %s1199_s30   ;;  %s1199_s30 = sphi %s1265_s30, %s1483_s30   ;;  %s1195_s29 = sphi %s1263_s29, %s1482_s29   ;;  %s1191_s28 = sphi %s1261_s28, %s1481_s28   ;;  %s1187_s27 = sphi %s1259_s27, %s1480_s27  }
   0x9   : > { %p874_p0 = scmp.ge.s32.totalorder %s1199_s30, 1  ;;  %p72_p1 = scmp.eq.s32.totalorder %s1283_s12, 0 }
   0xa   : > { %p234_p2 = scmp.lt.s32.totalorder %s1199_s30, 3  ;;  %s1201_s14 = smov [#allocation5]  }
   0xb   : > { %s259_s15 = sshll.u32 %s1201_s14, 4  ;;  %s1202_s16 = smov 128   ;;  %s260_s15 = int_to_ptr.vmem [resolvable:$true] %s259_s15 }
   0xc   : > { %p1288_p3 = pnand %p874_p0, %p234_p2  ;;  %s1203_s17 = smov 8  }
   0xd   : > { %s873_s18 = sadd.s32 4294967294, %s1199_s30   ;;  %s1299_s19 = sadd.s32 1, %s1199_s30  }
   0xe   : > { %s257_s11 = sshll.u32 %s1471_s6, 4  ;;  %p971_p4 = pneg %p1288_p3  ;;  %s258_s11 = int_to_ptr.hbm [resolvable:$true] %s257_s11 }
   0xf   : > { %s58_s20 = sadd.s32 1, %s1195_s29  ;;  %s55_s21 = ssub.s32 %s1199_s30, %s1299_s19 }
  0x10   : > { %p972_p6 = pnand %p971_p4, %p72_p1  ;;  %p65_p7 = scmp.ne.s32.totalorder %s1195_s29, %s1191_s28 }
  0x11   : > { %p56_p8 = scmp.eq.s32.totalorder %s55_s21, 0  ;;  %p66_p9 = scmp.eq.s32.totalorder %s1199_s30, 0 }
  0x12   : > { %974 = dma.hbm_to_vmem [thread:$0]  (!%p972_p6), %s258_s11, 256, %s260_s15, [#allocation6], %s1202_s16, %s1202_s16, %s1203_s17  }
  0x13   : > { %p71_p10 = scmp.ne.s32.totalorder %s1191_s28, %s1187_s27  ;;  %p221_p11 = scmp.eq.s32.totalorder %s1283_s12, 1 }
  0x14   : > { %s1311_s22 = scalar_select %p56_p8, %s1195_s29, %s58_s20  }
  0x15   : > { %p1315_p12 = por %p72_p1, %p71_p10  ;;  %p1319_p13 = por %p221_p11, %p65_p7 }
  0x16   : > { %1473 = sst [smem:[#allocation11_spill]] %s1311_s22  ;;  %p227_p0 = scmp.eq.s32.totalorder %s873_s18, 1 }
  0x17   : > { %p67_p2 = por %p66_p9, %p65_p7  ;;  %s284_s25 = sand.u32 1, %s1195_s29  }
  0x18   : > { %p1324_p4 = por %p227_p0, %p71_p10  ;;  %p984_p6 = scmp.lt.s32.totalorder %s1199_s30, 2 }
  0x19   : > { %s877_s9 = sshll.u32 %s284_s25, 1  ;;  %s878_s10 = sshll.u32 %s1199_s30, 1 }
  0x1a   : > { %s292_s15 = scalar_lea.hbm %s1462_s1, %s878_s10  ;;  %s288_s17 = scalar_lea.vmem [#allocation2], %s877_s9 }
  0x1b   : > { %s294_s16 = sshll.u32 %s292_s15, 4  ;;  %s296_s20 = sshll.u32 %s288_s17, 4  ;;  %s295_s16 = int_to_ptr.hbm [resolvable:$true] %s294_s16  ;;  %s297_s20 = int_to_ptr.vmem [resolvable:$true] %s296_s20 }
  0x1c   : > { %p1333_p8 = pnand %p984_p6, %p67_p2  ;;  %s285_s21 = scalar_lea.sflag [#allocation3], %s284_s25 }
  0x1d   : > { %s1099_s6 = sshra.s32 %s295_s16, 4  ;;  %s1106_s9 = scalar_lea.hbm %s1462_s1, 4  ;;  %s1100_s6 = int_to_ptr.hbm [resolvable:$true] %s1099_s6 }
  0x1e   : > { %s1101_s22 = scalar_lea.hbm %s1100_s6, 2  ;;  %p1103_p9 = pneg %p1333_p8 }
  0x1f   : > { %p1102_p7 = scmp.ne.s32.totalorder %s1100_s6, %s1101_s22  ;;  %p1107_p0 = scmp.lt.s32.totalorder %s1100_s6, %s1462_s1 }
  0x20   : > { %p1108_p2 = scmp.lt.s32.totalorder %s1106_s9, %s1101_s22 }
  0x21   : > { %p1104_p10 = pnand %p1103_p9, %p1102_p7 }
  0x22   : > { %p1109_p6 = por %p1108_p2, %p1107_p0 }
  0x23   : > { %p1105_p11 = pneg %p1104_p10 }
  0x25   : > { %p1110_p5 = pnand %p1109_p6, %p1105_p11 }
  0x27   : > { %1113 = shalt.err (!%p1110_p5)
}
  0x28   : > { %978 = dma.hbm_to_vmem [thread:$0]  (!%p1333_p8), %s295_s16, 32, %s297_s20, %s285_s21  }
  0x29   : > { %305 = sbr.rel (%p1288_p3) target bundleno = 760 (0x2f8), region = 52  ;;  %s1350_s25 = sand.u32 (!%p1288_p3), 1, %s1191_s28  }
  0x2a   : > { %s880_s17 = sshll.u32 (!%p1288_p3), %s1350_s25, 1  ;;  %s308_s10 = scalar_lea.sflag (!%p1288_p3), [#allocation3], %s1350_s25 }
  0x2b   : > { %s1354_s11 = scalar_lea.vmem (!%p1288_p3), [#allocation2], %s880_s17 }
  0x2e   : > { %1174 = dma.done.wait (%p1315_p12), %s308_s10, 32  }
  0x2f   : > { %1176 = vsyncadd (%p1315_p12), %s308_s10, 4294967264 }
  0x30   : > { %1178 = dma.done.wait (%p72_p1), [#allocation6], 256  }
  0x31   : > { %1180 = vsyncadd (%p72_p1), [#allocation6], 4294967040  ;;  %p355_p3 = scmp.lt.s32.totalorder %s1283_s12, 1  ;;  %v954_v0 = vld [vmem:[%s1463_s2] sm:$0xff]  ;;  %v955_v1 = vld [vmem:[%s1463_s2 + $0x8] sm:$0xff]  ;;  %vm384_vm0 = vcmask 130048  }
  0x32   : > { %v956_v2 = vld [vmem:[%s1463_s2 + $0x10] sm:$0xff]  ;;  %398 = vmatpush.bf16.msra.mxu0 %v954_v0  ;;  %426 = vmatpush.bf16.msra.mxu1 %v955_v1  ;;  %vm469_vm1 = vcmask 1043456   ;;  %s1204_s17 = smov 16   ;;  %s1205_s10 = smov 48   ;;  %vm558_vm2 = vcmask 261120   ;;  %vm561_vm3 = vcmask 392192   ;;  %vm929_vm14 = vmneg %vm384_vm0 }
  0x33   : > { %s356_s6 = scalar_select %p355_p3, %s1283_s12, 1  ;;  %454 = vmatpush.bf16.msra.mxu2 %v956_v2  ;;  %vm564_vm4 = vcmask 523264   ;;  %vm567_vm5 = vcmask 654336   ;;  %vm570_vm6 = vcmask 785408   ;;  %vm573_vm7 = vcmask 916480  }
  0x34   : > { %s1208_s22 = smov 64   ;;  %s1209_s16 = smov 112   ;;  %vm590_vm8 = vcmask 1045504   ;;  %vm586_vm9 = vcmask 97280   ;;  %vm639_vm12 = vcmask 1041408   ;;  %vm635_vm13 = vcmask 31744  }
  0x35   : > { %s951_s13 = sshll.u32 %s356_s6, 4  ;;  %s1206_s6 = smov 32  }
  0x36   : > { %s359_s20 = scalar_lea.vmem %s1461_s0, %s951_s13  ;;  %s1207_s13 = smov 80  }
  0x37   : > { %v952_v3 = vld [vmem:[%s359_s20] sm:$0xff]  ;;  %v953_v4 = vld [vmem:[%s359_s20 + $0x8] sm:$0xff]  ;;  %s1210_s20 = smov 96   ;;  %s882_s18 = sshll.u32 %s1350_s25, 4 }
  0x38   : > { %897 = vmatmul.msk.bf16.vlgmr.msra.gmra.mxu0 %vm384_vm0, %v952_v3  ;;  %905 = vmatmul.msk.bf16.vlgmr.msra.gmra.mxu1 %vm384_vm0, %v952_v3  ;;  %s962_s21 = sshll.u32 %s1283_s12, 4  ;;  %s354_s15 = scalar_lea.vmem [#allocation7], %s882_s18 }
  0x39   : > { %913 = vmatmul.msk.bf16.vlgmr.msra.gmra.mxu2 %vm384_vm0, %v952_v3  ;;  %s774_s14 = scalar_lea.hbm %s1469_s8, %s962_s21  ;;  %s763_s12 = scalar_lea.sflag [#allocation4], %s1350_s25 }
  0x48   : > { %898 = vmatmul.msk.bf16.gmra.mxu0 %vm384_vm0, %v953_v4  ;;  %906 = vmatmul.msk.bf16.gmra.mxu1 %vm384_vm0, %v953_v4 }
  0x49   : > { %914 = vmatmul.msk.bf16.gmra.mxu2 %vm384_vm0, %v953_v4 }
  0xb5   : > { %v400_v5 = vpop.f32.mrf.mxu0  ;;  %v428_v6 = vpop.f32.mrf.mxu1 }
  0xb6   : > { %v467_v7 = vrot.slane %v428_v6, 4  ;;  %v472_v8 = vrot.slane %v400_v5, 4 }
  0xb8   : > { %v470_v9 = vsel %vm469_vm1, %v400_v5, %v467_v7  ;;  %v476_v10 = vsel %vm469_vm1, %v472_v8, %v428_v6 }
  0xbc   : > { %v456_v11 = vpop.f32.mrf.mxu2 }
  0xbd   : > { %v475_v12 = vrot.slane %v456_v11, 4  ;;  %v402_v13 = vpop.f32.mrf.mxu0  ;;  %v430_v14 = vpop.f32.mrf.mxu1 }
  0xbe   : > { %v482_v16 = vrot.slane %v402_v13, 4  ;;  %v478_v17 = vrot.slane %v430_v14, 4 }
  0xbf   : > { %v1032_v15 = vpack.i.bf16 %v475_v12, %v476_v10 }
  0xc0   : > { %v486_v22 = vsel %vm469_vm1, %v482_v16, %v430_v14  ;;  %v480_v23 = vsel %vm469_vm1, %v402_v13, %v478_v17  ;;  %v957_v17 = vld [vmem:[%s1464_s3] sm:$0xff] }
  0xc1   : > { %1033 = vrot.lane.b32.xlu0 %v1032_v15, %s1204_s17 }
  0xc4   : > { %v458_v18 = vpop.f32.mrf.mxu2 }
  0xc5   : > { %v485_v19 = vrot.slane %v458_v18, 4  ;;  %v405_v20 = vpop.f32.mrf.mxu0  ;;  %v433_v21 = vpop.f32.mrf.mxu1  ;;  %v1037_v24 = vpack.i.bf16 %v458_v18, %v480_v23  ;;  %v579_v18 = vld [vmem:[#allocation5] sm:$0xff] }
  0xc6   : > { %v492_v26 = vrot.slane %v405_v20, 4  ;;  %v488_v27 = vrot.slane %v433_v21, 4 }
  0xc7   : > { %v1042_v25 = vpack.i.bf16 %v485_v19, %v486_v22  ;;  %v580_v22 = vld [vmem:[#allocation5 + $0x8] sm:$0xff] }
  0xc8   : > { %v496_v28 = vsel %vm469_vm1, %v492_v26, %v433_v21  ;;  %v490_v30 = vsel %vm469_vm1, %v405_v20, %v488_v27 }
  0xc9   : > { %1043 = vrot.lane.b32.xlu1 %v1042_v25, %s1205_s10  ;;  %1038 = vrot.lane.b32.xlu0 %v1037_v24, %s1206_s6  ;;  %s777_s10 = sshll.u32 %s774_s14, 4  ;;  %s778_s10 = int_to_ptr.hbm [resolvable:$true] %s777_s10 }
  0xcc   : > { %v461_v29 = vpop.f32.mrf.mxu2 }
  0xcd   : > { %v495_v31 = vrot.slane %v461_v29, 4  ;;  %v1047_v32 = vpack.i.bf16 %v461_v29, %v490_v30  ;;  %v407_v33 = vpop.f32.mrf.mxu0  ;;  %v435_v34 = vpop.f32.mrf.mxu1 }
  0xce   : > { %v502_v36 = vrot.slane %v407_v33, 4  ;;  %v498_v37 = vrot.slane %v435_v34, 4 }
  0xcf   : > { %v1052_v35 = vpack.i.bf16 %v495_v31, %v496_v28 }
  0xd0   : > { %v506_v40 = vsel %vm469_vm1, %v502_v36, %v435_v34  ;;  %v500_v41 = vsel %vm469_vm1, %v407_v33, %v498_v37  ;;  %v365_v33 = vld [vmem:[%s1354_s11] sm:$0x3]  ;;  %v960_v36 = vld [vmem:[%s1465_s4 + $0x8] sm:$0xff]  ;;  %s1143_s11 = sshra.s32 %s778_s10, 4  ;;  %s1144_s11 = int_to_ptr.hbm [resolvable:$true] %s1143_s11 }
  0xd1   : > { %1053 = vrot.lane.b32.xlu2 %v1052_v35, %s1207_s13  ;;  %1048 = vrot.lane.b32.xlu1 %v1047_v32, %s1208_s22  ;;  %v641_v34 = vsel %vm639_vm12, %v365_v33, 0  ;;  %v958_v35 = vld [vmem:[%s1466_s5] sm:$0xff]  ;;  %s1145_s6 = scalar_lea.hbm %s1144_s11, 16  ;;  %p1150_p8 = scmp.lt.s32.totalorder %s1144_s11, %s1469_s8 }
  0xd2   : > { %v618_v37 = vld [vmem:[%s1468_s7] sm:$0xff]  ;;  %p1146_p1 = scmp.ne.s32.totalorder %s1144_s11, %s1145_s6 }
  0xd4   : > { %v463_v38 = vpop.f32.mrf.mxu2  ;;  %p1147_p5 = pnand %p1146_p1, %p1319_p13 }
  0xd5   : > { %v505_v39 = vrot.slane %v463_v38, 4  ;;  %v1057_v43 = vpack.i.bf16 %v463_v38, %v500_v41  ;;  %v619_v38 = vld [vmem:[%s1468_s7 + $0x8] sm:$0xff]  ;;  %v959_v41 = vld [vmem:[%s1465_s4] sm:$0xff] }
  0xd6   : > { %p1148_p12 = pneg %p1147_p5 }
  0xd7   : > { %v1062_v42 = vpack.i.bf16 %v505_v39, %v506_v40  ;;  %v1211_v39 = vmov 0  }
  0xd8   : > { %1068 = vset.pattern.permute.xlu1 %v1211_v39  ;;  %1067 = vset.pattern.permute.xlu0 %v1211_v39 }
  0xd9   : > { %1063 = vrot.lane.b32.xlu0 %v1062_v42, %s1209_s16  ;;  %1058 = vrot.lane.b32.xlu2 %v1057_v43, %s1210_s20 }
  0xe1   : > { %622 = vperm.xlu0 %1067, %v618_v37  }
 0x12b   : > { %v1054_v47 = vpop.permute.xlu2 %1053 }
 0x12c   : > { %v1056_v1 = vunpack.i.h.bf16 %v1054_v47  ;;  %v1055_v2 = vunpack.i.l.bf16 %v1054_v47 }
 0x133   : > { %v1034_v44 = vpop.permute.xlu0 %1033  ;;  %v1059_v3 = vpop.permute.xlu2 %1058 }
 0x134   : > { %v1036_v48 = vunpack.i.h.bf16 %v1034_v44  ;;  %v1035_v49 = vunpack.i.l.bf16 %v1034_v44  ;;  %v1061_v6 = vunpack.i.h.bf16 %v1059_v3  ;;  %v1060_v7 = vunpack.i.l.bf16 %v1059_v3  ;;  %v961_v44 = vld [vmem:[%s1465_s4 + $0x10] sm:$0xff] }
 0x136   : > { %v557_v52 = vsel %vm384_vm0, %v456_v11, %v1036_v48  ;;  %v556_v53 = vsel %vm384_vm0, %v470_v9, %v1035_v49 }
 0x13b   : > { %v1044_v45 = vpop.permute.xlu1 %1043  ;;  %v1039_v46 = vpop.permute.xlu0 %1038 }
 0x13c   : > { %v1041_v50 = vunpack.i.h.bf16 %v1039_v46  ;;  %v1040_v51 = vunpack.i.l.bf16 %v1039_v46  ;;  %v1046_v54 = vunpack.i.h.bf16 %v1044_v45  ;;  %v1045_v55 = vunpack.i.l.bf16 %v1044_v45 }
 0x13e   : > { %v560_v56 = vsel %vm558_vm2, %v557_v52, %v1041_v50  ;;  %v559_v57 = vsel %vm558_vm2, %v556_v53, %v1040_v51 }
 0x13f   : > { %v562_v61 = vsel %vm561_vm3, %v559_v57, %v1045_v55  ;;  %v563_v62 = vsel %vm561_vm3, %v560_v56, %v1046_v54 }
 0x143   : > { %v1049_v58 = vpop.permute.xlu1 %1048 }
 0x144   : > { %v1051_v59 = vunpack.i.h.bf16 %v1049_v58  ;;  %v1050_v60 = vunpack.i.l.bf16 %v1049_v58 }
 0x146   : > { %v566_v63 = vsel %vm564_vm4, %v563_v62, %v1051_v59  ;;  %v565_v0 = vsel %vm564_vm4, %v562_v61, %v1050_v60 }
 0x147   : > { %v568_v4 = vsel %vm567_vm5, %v565_v0, %v1055_v2  ;;  %v569_v5 = vsel %vm567_vm5, %v566_v63, %v1056_v1 }
 0x148   : > { %v571_v11 = vsel %vm570_vm6, %v568_v4, %v1060_v7  ;;  %v572_v12 = vsel %vm570_vm6, %v569_v5, %v1061_v6 }
 0x14b   : > { %v1064_v8 = vpop.permute.xlu0 %1063 }
 0x14c   : > { %v1066_v9 = vunpack.i.h.bf16 %v1064_v8  ;;  %v1065_v10 = vunpack.i.l.bf16 %v1064_v8 }
 0x14e   : > { %v574_v13 = vsel %vm573_vm7, %v571_v11, %v1065_v10  ;;  %v575_v14 = vsel %vm573_vm7, %v572_v12, %v1066_v9 }
 0x14f   : > { %v578_v15 = vpack.c.bf16 %v575_v14, %v574_v13 }
 0x151   : > { %v592_v16 = vsel %vm590_vm8, %v578_v15, 0 }
 0x152   : > { %601 = vmatpush.bf16.msra.mxu3 %v592_v16 }
 0x153   : > { %v623_v46 = vpop.permute.xlu0 %622 }
 0x155   : > { %919 = vmatmul.msk.bf16.vlgmr.msra.gmra.mxu3 %vm586_vm9, %v957_v17 }
 0x156   : > { %650 = vmatpush.bf16.msrb.mxu3 %v641_v34 }
 0x165   : > { %924 = vmatmul.msk.bf16.vlgmr.msrb.gmra.mxu3 %vm635_vm13, %v958_v35 }
 0x1d8   : > { %v603_v19 = vpop.f32.mrf.mxu3 }
 0x1d9   : > { %v604_v20 = vadd.f32 %v603_v19, %v579_v18 }
 0x1db   : > { %v610_v21 = vmul.f32 0.01, %v604_v20  ;;  %vm608_vm10 = vcmp.ge.f32.partialorder %v604_v20, 0.0 }
 0x1dd   : > { %v612_v24 = vsel %vm608_vm10, %v604_v20, %v610_v21 }
 0x1de   : > { %v614_v27 = vpack.c.bf16 %v612_v24, %v612_v24 }
 0x1e0   : > { %v605_v23 = vpop.f32.mrf.mxu3  ;;  %v659_v30 = vunpack.c.l.b16 %v614_v27 }
 0x1e1   : > { %v606_v25 = vadd.f32 %v605_v23, %v580_v22 }
 0x1e3   : > { %vm609_vm11 = vcmp.ge.f32.partialorder %v606_v25, 0.0  ;;  %v611_v26 = vmul.f32 0.01, %v606_v25 }
 0x1e5   : > { %v613_v28 = vsel %vm609_vm11, %v606_v25, %v611_v26 }
 0x1e6   : > { %v615_v29 = vpack.c.bf16 %v613_v28, %v613_v28 }
 0x1e8   : > { %v660_v31 = vunpack.c.l.b16 %v615_v29  ;;  %v652_v45 = vpop.f32.mrf.mxu3 }
 0x1e9   : > { %v653_v47 = vadd.f32 %v652_v45, %v623_v46 }
 0x1ea   : > { %v661_v32 = vpack.c.b16 %v660_v31, %v659_v30 }
 0x1ec   : > { %662 = vrot.lane.b32.xlu2 %v661_v32, %s1204_s17  ;;  %722 = vrot.lane.b32.xlu1 %v661_v32, %s1209_s16  ;;  %s775_s17 = sshll.u32 %s354_s15, 4  ;;  %s1149_s16 = scalar_lea.hbm %s1469_s8, 32  ;;  %s776_s17 = int_to_ptr.vmem [resolvable:$true] %s775_s17 }
 0x1ed   : > { %713 = vmatpush.bf16.msrb.mxu1 %v661_v32  ;;  %p1151_p7 = scmp.lt.s32.totalorder %s1149_s16, %s1145_s6 }
 0x1ef   : > { %p1152_p9 = por %p1151_p7, %p1150_p8 }
 0x1f0   : > { %938 = vmatmul.msk.bf16.vlgmr.msrb.gmra.mxu1 %vm384_vm0, %v960_v36  ;;  %v654_v51 = vpop.f32.mrf.mxu3 }
 0x1f1   : > { %p1153_p10 = pnand %p1152_p9, %p1148_p12 }
 0x1f4   : > { %627 = vperm.xlu1 %1068, %v619_v38  }
 0x246   : > { %v663_v40 = vpop.permute.xlu2 %662 }
 0x247   : > { %930 = vmatpush.bf16.msk.msrb.mxu0 %vm929_vm14, %v663_v40 }
 0x24a   : > { %931 = vmatmul.msk.bf16.vlgmr.msrb.gmra.mxu0 %vm384_vm0, %v959_v41 }
 0x25e   : > { %v723_v42 = vpop.permute.xlu1 %722 }
 0x25f   : > { %v725_v43 = vsel %vm573_vm7, %v723_v42, 0 }
 0x260   : > { %745 = vmatpush.bf16.msrb.mxu2 %v725_v43 }
 0x263   : > { %945 = vmatmul.msk.bf16.vlgmr.msrb.gmra.mxu2 %vm384_vm0, %v961_v44 }
 0x266   : > { %v628_v52 = vpop.permute.xlu1 %627 }
 0x267   : > { %v655_v54 = vadd.f32 %v654_v51, %v628_v52 }
 0x26d   : > { %v715_v50 = vpop.f32.mrf.mxu1 }
 0x275   : > { %v717_v60 = vpop.f32.mrf.mxu1 }
 0x2c7   : > { %v687_v48 = vpop.f32.mrf.mxu0 }
 0x2c8   : > { %v692_v49 = vadd.f32 %v687_v48, %v653_v47 }
 0x2ca   : > { %v720_v53 = vadd.f32 %v715_v50, %v692_v49 }
 0x2cf   : > { %v689_v56 = vpop.f32.mrf.mxu0 }
 0x2d0   : > { %v693_v59 = vadd.f32 %v689_v56, %v655_v54 }
 0x2d2   : > { %v721_v62 = vadd.f32 %v717_v60, %v693_v59 }
 0x2e6   : > { %v747_v55 = vpop.f32.mrf.mxu2 }
 0x2e7   : > { %v752_v57 = vadd.f32 %v747_v55, %v720_v53 }
 0x2e9   : > { %vm754_vm15 = vcmp.ge.f32.partialorder %v752_v57, 0.0  ;;  %v756_v58 = vmul.f32 0.01, %v752_v57 }
 0x2eb   : > { %v758_v61 = vsel %vm754_vm15, %v752_v57, %v756_v58 }
 0x2ec   : > { %760 = vst [vmem:[%s354_s15] sm:$0xff] %v758_v61 }
 0x2ee   : > { %v749_v63 = vpop.f32.mrf.mxu2 }
 0x2ef   : > { %v753_v0 = vadd.f32 %v749_v63, %v721_v62 }
 0x2f1   : > { %vm755_vm0 = vcmp.ge.f32.partialorder %v753_v0, 0.0  ;;  %v757_v1 = vmul.f32 0.01, %v753_v0 }
 0x2f3   : > { %v759_v2 = vsel %vm755_vm0, %v753_v0, %v757_v1 }
 0x2f4   : > { %761 = vst [vmem:[%s354_s15 + $0x8] sm:$0xff] %v759_v2 }
 0x2f5   : > { %1156 = shalt.err (!%p1153_p10)
}
 0x2f6   : > { %s1212_s25 = smov 128   ;;  %s1213_s21 = smov 8  }
 0x2f7   : > { %969 = dma.vmem_to_hbm [thread:$0]  (%p1319_p13), %s776_s17, 256, %s778_s10, %s763_s12, %s1212_s25, %s1212_s25, %s1213_s21  }
 0x2f8 PF: > { %s792_s23 = sand.u32 1, %s1187_s27   ;;  %p1478_p11 = scmp.ge.s32.totalorder %s1199_s30, 2 }
 0x2f9   : > { %s793_s9 = scalar_lea.sflag [#allocation4], %s792_s23 }
 0x2fa   : > { %p980_p0 = pnand %p1478_p11, %p1324_p4 }
 0x2fc   : > { %p981_p2 = pneg %p980_p0 }
 0x2fe   : > { %1182 = dma.done.wait (%p981_p2), %s793_s9, 256  }
 0x2ff   : > { %1184 = vsyncadd (%p981_p2), %s793_s9, 4294967040  ;;  %s1479_s14 = sld [smem:[#allocation11_spill]]  ;;  %p22_p6 = scmp.ge.s32.totalorder %s1299_s19, 4  }
 0x300   : > { %s1480_s27 = smov %s1191_s28  ;;  %s1481_s28 = smov %s1195_s29 }
 0x301   : > { %s1483_s30 = smov %s1299_s19  ;;  %24 = sbr.rel (!%p22_p6) target bundleno = 8 (0x8), region = 108 }
 0x305   : > { %s1482_s29 = smov %s1479_s14 }
 0x306   :  { %799 = vsyncpa [#allocation3], 1 }
 0x307   :  { %801 = vsyncpa [#allocation3 + $0x1], 1 }
 0x308   :  { %802 = vsyncpa [#allocation6], 1 }
 0x309   :  { %803 = vsyncpa [#allocation4], 1 }
 0x30a   :  { %805 = vsyncpa [#allocation4 + $0x1], 1 }

</bundles_post_ra>
